<compile_context>
chip_gen: v7x
topology: tpu7x:2x2x1
jax: 0.10.0
libtpu: 0.0.40
codegen_flags: <defaults>
</compile_context>

<pallas_src>
import jax
import jax.numpy as jnp
from jax.experimental import pallas as pl
from jax.experimental.pallas import tpu as pltpu


_LANE = 128
_SUBLANE = 8
_VMEM_BUDGET = 40 * 1024 * 1024   # tile-sizing budget (safe on v7x's 64 MiB VMEM)
_VMEM_LIMIT = 48 * 1024 * 1024    # explicit scoped-VMEM limit (< 64 MiB physical)


def _round_up(v, m):
    return -(-v // m) * m


def _domain_embed_kernel(x_ref, ids_ref, w_ref, emb_ref, o_ref):
    """One batch tile: out = x @ W.T + (emb_table + bias)[ids]."""
    # x_ref:   [TB, D_in]    compute dtype (per-tile, pipelined)
    # ids_ref: [TB, 1]       int32         (per-tile, pipelined)
    # w_ref:   [E_pad, D_in] compute dtype (resident; PyTorch Linear layout, no host transpose)
    # emb_ref: [ND, E_pad]   compute dtype (resident; Linear bias already folded in)
    # o_ref:   [TB, E_pad]   float32       (lane-dense store)
    x_proj = jax.lax.dot_general(
        x_ref[...], w_ref[...],
        dimension_numbers=(((1,), (1,)), ((), ())),   # contract D_in with D_in
        preferred_element_type=jnp.float32,
    )                                                  # [TB, E_pad], f32 accumulate

    # Fused embedding gather: one_hot(ids) @ table on the MXU.  0/1 weights make
    # this an exact gather; no [B, E] intermediate ever touches HBM.
    ids = ids_ref[...]                                                     # [TB, 1]
    nd = emb_ref.shape[0]
    dom_iota = jax.lax.broadcasted_iota(jnp.int32, (ids.shape[0], nd), 1)  # [TB, ND]
    onehot = (dom_iota == ids).astype(emb_ref.dtype)                       # [TB, ND]
    domain_emb = jnp.dot(onehot, emb_ref[...],
                         preferred_element_type=jnp.float32)               # [TB, E_pad]

    # Epilogue add in f32 on the VPU (bias already folded into emb_ref).
    o_ref[...] = (x_proj + domain_emb).astype(o_ref.dtype)


def professional_domain_embedding(x, domain_ids, emb_table, w, b, *,
                                  block_b=1024,
                                  compute_dtype=jnp.float32,
                                  keep_padded=False):
    """Pallas-backed forward pass of ProfessionalDomainEmbedding.

    Args:
      x:          [B, D_in] float32
      domain_ids: [B] int32
      emb_table:  [num_domains, E] float32  (nn.Embedding weight)
      w:          [E, D_in] float32         (nn.Linear weight, PyTorch layout)
      b:          [E] float32               (nn.Linear bias)
      block_b:    requested batch tile size (auto-rounded / capped).
      compute_dtype: dtype streamed into the MXU (f32 default; bf16 halves HBM
                  traffic on v6e/v7x, accumulation stays f32).
      keep_padded: if True return the [B, E_pad] lane-dense slab (padded
                  columns are exactly zero) instead of slicing back to E.

    Returns:
      [B, E] float32 (or [B, E_pad] if keep_padded).
    """
    B, d_in = x.shape
    E, d_in_w = w.shape
    assert d_in_w == d_in, (w.shape, x.shape)
    nd = emb_table.shape[0]

    cdt = jnp.dtype(compute_dtype)
    csize = cdt.itemsize
    e_pad = _round_up(E, _LANE)

    # ---- host-side (one-time) parameter prep -----------------------------
    # Fold the Linear bias into the embedding table and zero-pad the feature
    # dim to a multiple of 128 for a lane-dense out_spec / store.
    emb_aug = emb_table.astype(jnp.float32) + b.astype(jnp.float32)[None, :]
    emb_aug = jnp.pad(emb_aug, ((0, 0), (0, e_pad - E))).astype(cdt)   # [ND, E_pad]
    w_pad = jnp.pad(w, ((0, e_pad - E), (0, 0))).astype(cdt)           # [E_pad, D_in]
    x_c = x.astype(cdt)
    ids2 = domain_ids.reshape(B, 1).astype(jnp.int32)

    # ---- batch tile selection --------------------------------------------
    def vmem_bytes(tb_):
        # Double-buffered streams + residents (counted double-buffered as the
        # worst case in case pl.Buffered(1) is unavailable).
        stream = 2 * (tb_ * d_in * csize        # x tile
                      + tb_ * _LANE * 4         # ids tile ((tb,1) i32 pads to 128 lanes)
                      + tb_ * e_pad * 4)        # f32 output tile
        resident = 2 * (e_pad * d_in + nd * e_pad) * csize
        return stream + resident

    if B < 16:
        tb = B                                  # single full-batch block
    else:
        tb = max(_SUBLANE, (min(block_b, B) // _SUBLANE) * _SUBLANE)
        # Never collapse to a single grid step: with >=2 steps the "parallel"
        # batch axis can shard across both v7x TensorCores.
        tb = min(tb, _round_up(pl.cdiv(B, 2), _SUBLANE))
        # Respect the VMEM budget (v7x has only 64 MiB physical VMEM).
        while tb > _SUBLANE and vmem_bytes(tb) > _VMEM_BUDGET:
            tb = max(_SUBLANE, ((tb // 2) // _SUBLANE) * _SUBLANE)
    # TODO(synk): if the resident W alone blows the VMEM budget (very large
    # D_in*E), add a K grid axis ("arbitrary", last) with an f32 accumulator.

    grid = (pl.cdiv(B, tb),)

    # Advisory cost model: only the real projection matmul is counted as flops
    # (the one-hot gather is synthetic work).
    flops = 2 * B * d_in * e_pad
    bytes_accessed = (csize * (B * d_in + e_pad * d_in + nd * e_pad)
                      + 4 * B + 4 * B * e_pad)

    def launch(single_buffer_residents):
        res_kw = ({"pipeline_mode": pl.Buffered(1)}
                  if single_buffer_residents else {})
        grid_spec = pltpu.PrefetchScalarGridSpec(
            num_scalar_prefetch=0,
            grid=grid,
            in_specs=[
                pl.BlockSpec((tb, d_in), lambda i: (i, 0)),               # x: per-tile
                pl.BlockSpec((tb, 1), lambda i: (i, 0)),                  # ids: per-tile
                pl.BlockSpec((e_pad, d_in), lambda i: (0, 0), **res_kw),  # W: resident
                pl.BlockSpec((nd, e_pad), lambda i: (0, 0), **res_kw),    # emb+b: resident
            ],
            out_specs=pl.BlockSpec((tb, e_pad), lambda i: (i, 0)),        # lane-dense
        )
        return pl.pallas_call(
            _domain_embed_kernel,
            out_shape=jax.ShapeDtypeStruct((B, e_pad), jnp.float32),
            grid_spec=grid_spec,
            compiler_params=pltpu.CompilerParams(
                dimension_semantics=("parallel",),
                vmem_limit_bytes=_VMEM_LIMIT,
            ),
            cost_estimate=pl.CostEstimate(
                flops=flops, transcendentals=0, bytes_accessed=bytes_accessed),
        )(x_c, ids2, w_pad, emb_aug)

    try:
        out = launch(single_buffer_residents=True)
    except Exception:
        # This jax build rejects pl.Buffered(1); resident inputs fall back to
        # the default double buffering (correctness unaffected, costs one extra
        # VMEM copy of W / emb).
        out = launch(single_buffer_residents=False)

    if keep_padded:
        return out                               # padded columns are exactly zero
    return out[:, :E] if e_pad != E else out


def _reference(x, domain_ids, emb_table, w, b):
    # Pure-JAX f32 reference mirroring the PyTorch forward.
    domain_emb = jnp.take(emb_table, domain_ids, axis=0)
    return x @ w.T + b + domain_emb


def _run_case(key, batch, input_dim, embedding_dim, num_domains, *,
              block_b=1024, compute_dtype=jnp.float32, atol=1e-5, rtol=1e-5):
    k_x, k_ids, k_emb, k_w, k_b = jax.random.split(key, 5)

    x = jax.random.normal(k_x, (batch, input_dim), dtype=jnp.float32)
    domain_ids = jax.random.randint(k_ids, (batch,), 0, num_domains, dtype=jnp.int32)

    # Synthetic parameters (shapes per nn.Embedding / nn.Linear).
    emb_table = jax.random.normal(k_emb, (num_domains, embedding_dim), dtype=jnp.float32)
    limit = 1.0 / (input_dim ** 0.5)
    w = jax.random.uniform(k_w, (embedding_dim, input_dim),
                           minval=-limit, maxval=limit, dtype=jnp.float32)
    b = jax.random.uniform(k_b, (embedding_dim,),
                           minval=-limit, maxval=limit, dtype=jnp.float32)

    out = professional_domain_embedding(
        x, domain_ids, emb_table, w, b,
        block_b=block_b, compute_dtype=compute_dtype)
    out = jax.block_until_ready(out)
    assert out.shape == (batch, embedding_dim), out.shape

    ref = _reference(x, domain_ids, emb_table, w, b)
    max_err = float(jnp.max(jnp.abs(out - ref)))
    assert jnp.allclose(out, ref, atol=atol, rtol=rtol), (
        f"mismatch vs reference (B={batch}, block_b={block_b}, "
        f"dtype={jnp.dtype(compute_dtype).name}, max_err={max_err})")


if __name__ == "__main__":
    input_dim = 32
    embedding_dim = 16
    num_domains = 5

    key = jax.random.PRNGKey(0)
    k1, k2, k3, k4 = jax.random.split(key, 4)

    # Primary small case from the module spec (single block, grid=(1,)).
    _run_case(k1, batch=2, input_dim=input_dim, embedding_dim=embedding_dim,
              num_domains=num_domains)
    # Multi-step grid: batch tiling + resident-weight index_maps.
    _run_case(k2, batch=24, input_dim=input_dim, embedding_dim=embedding_dim,
              num_domains=num_domains, block_b=8)
    # Ragged batch with the auto tile picker: >=2 grid steps, masked last block.
    _run_case(k3, batch=20, input_dim=input_dim, embedding_dim=embedding_dim,
              num_domains=num_domains)
    # bf16 streaming path (v6e/v7x bandwidth option), f32 accumulation.
    _run_case(k4, batch=24, input_dim=input_dim, embedding_dim=embedding_dim,
              num_domains=num_domains, compute_dtype=jnp.bfloat16,
              atol=5e-2, rtol=5e-2)

    print("KERNEL_OK")
</pallas_src>

<mosaic_0001>
module attributes {stable_mosaic.version = 11 : i64} {
  func.func @_domain_embed_kernel(%arg0: i32, %arg1: memref<2x32xf32, #tpu.memory_space<vmem>>, %arg2: memref<2x1xi32, #tpu.memory_space<vmem>>, %arg3: memref<128x32xf32, #tpu.memory_space<vmem>>, %arg4: memref<5x128xf32, #tpu.memory_space<vmem>>, %arg5: memref<2x128xf32, #tpu.memory_space<vmem>>) attributes {dimension_semantics = [#tpu.dimension_semantics<parallel>], iteration_bounds = array<i64: 1>, scalar_prefetch = 0 : i64, scratch_operands = 0 : i64, tpu.core_type = #tpu.core_type<tc>, window_params = [{transform_indices = @transform_0, window_bounds = array<i64: 2, 32>}, {transform_indices = @transform_1, window_bounds = array<i64: 2, 1>}, {pipeline_mode = #tpu.pipeline_mode<synchronous>, transform_indices = @transform_2, window_bounds = array<i64: 128, 32>}, {pipeline_mode = #tpu.pipeline_mode<synchronous>, transform_indices = @transform_3, window_bounds = array<i64: 5, 128>}, {transform_indices = @transform_4, window_bounds = array<i64: 2, 128>}]} {
    %c0 = arith.constant 0 : index
    %c0_0 = arith.constant 0 : index
    %0 = vector.load %arg1[%c0, %c0_0] : memref<2x32xf32, #tpu.memory_space<vmem>>, vector<2x32xf32>
    %c0_1 = arith.constant 0 : index
    %c0_2 = arith.constant 0 : index
    %1 = vector.load %arg3[%c0_1, %c0_2] : memref<128x32xf32, #tpu.memory_space<vmem>>, vector<128x32xf32>
    %cst = arith.constant dense<0.000000e+00> : vector<2x128xf32>
    %2 = tpu.matmul %0, %1, %cst {dimension_numbers = #tpu.dot_dimension_numbers<[1], [1], [0], [0], [0, 0, 1, 0], [], []>} : vector<2x32xf32>, vector<128x32xf32>, vector<2x128xf32> -> vector<2x128xf32>
    %c0_3 = arith.constant 0 : index
    %c0_4 = arith.constant 0 : index
    %3 = vector.load %arg2[%c0_3, %c0_4] : memref<2x1xi32, #tpu.memory_space<vmem>>, vector<2x1xi32>
    %4 = tpu.iota {dimensions = array<i32: 1>} : vector<2x5xi32>
    %5 = vector.broadcast %3 : vector<2x1xi32> to vector<2x5xi32>
    %6 = arith.cmpi eq, %4, %5 : vector<2x5xi32>
    %7 = arith.extui %6 : vector<2x5xi1> to vector<2x5xi32>
    %8 = arith.sitofp %7 : vector<2x5xi32> to vector<2x5xf32>
    %c0_5 = arith.constant 0 : index
    %c0_6 = arith.constant 0 : index
    %9 = vector.load %arg4[%c0_5, %c0_6] : memref<5x128xf32, #tpu.memory_space<vmem>>, vector<5x128xf32>
    %cst_7 = arith.constant dense<0.000000e+00> : vector<2x128xf32>
    %10 = tpu.matmul %8, %9, %cst_7 {dimension_numbers = #tpu.dot_dimension_numbers<[1], [0], [0], [1], [0, 0, 1, 1], [], []>} : vector<2x5xf32>, vector<5x128xf32>, vector<2x128xf32> -> vector<2x128xf32>
    %11 = arith.addf %2, %10 : vector<2x128xf32>
    %c0_8 = arith.constant 0 : index
    %c0_9 = arith.constant 0 : index
    %12 = vector.load %arg5[%c0_8, %c0_9] : memref<2x128xf32, #tpu.memory_space<vmem>>, vector<2x128xf32>
    tpu.vector_store %arg5[%c0_8, %c0_9], %11 {strides = array<i32>} : memref<2x128xf32, #tpu.memory_space<vmem>>, vector<2x128xf32>,
    return
  }
  func.func @transform_0(%arg0: i32) -> (i32, i32) {
    %c0_i32 = arith.constant 0 : i32
    %c0_i32_0 = arith.constant 0 : i32
    return %arg0, %c0_i32 : i32, i32
  }
  func.func @transform_1(%arg0: i32) -> (i32, i32) {
    %c0_i32 = arith.constant 0 : i32
    %c0_i32_0 = arith.constant 0 : i32
    return %arg0, %c0_i32 : i32, i32
  }
  func.func @transform_2(%arg0: i32) -> (i32, i32) {
    %c0_i32 = arith.constant 0 : i32
    %c0_i32_0 = arith.constant 0 : i32
    %c0_i32_1 = arith.constant 0 : i32
    return %c0_i32, %c0_i32_0 : i32, i32
  }
  func.func @transform_3(%arg0: i32) -> (i32, i32) {
    %c0_i32 = arith.constant 0 : i32
    %c0_i32_0 = arith.constant 0 : i32
    %c0_i32_1 = arith.constant 0 : i32
    return %c0_i32, %c0_i32_0 : i32, i32
  }
  func.func @transform_4(%arg0: i32) -> (i32, i32) {
    %c0_i32 = arith.constant 0 : i32
    %c0_i32_0 = arith.constant 0 : i32
    return %arg0, %c0_i32 : i32, i32
  }
}

module attributes {stable_mosaic.version = 11 : i64} {
  func.func @_domain_embed_kernel(%arg0: i32, %arg1: memref<2x32xf32, #tpu.memory_space<vmem>>, %arg2: memref<2x1xi32, #tpu.memory_space<vmem>>, %arg3: memref<128x32xf32, #tpu.memory_space<vmem>>, %arg4: memref<5x128xf32, #tpu.memory_space<vmem>>, %arg5: memref<2x128xf32, #tpu.memory_space<vmem>>) attributes {dimension_semantics = [#tpu.dimension_semantics<parallel>], iteration_bounds = array<i64: 1>, scalar_prefetch = 0 : i64, scratch_operands = 0 : i64, tpu.core_type = #tpu.core_type<tc>, window_params = [{transform_indices = @transform_0, window_bounds = array<i64: 2, 32>}, {transform_indices = @transform_1, window_bounds = array<i64: 2, 1>}, {pipeline_mode = #tpu.pipeline_mode<synchronous>, transform_indices = @transform_2, window_bounds = array<i64: 128, 32>}, {pipeline_mode = #tpu.pipeline_mode<synchronous>, transform_indices = @transform_3, window_bounds = array<i64: 5, 128>}, {transform_indices = @transform_4, window_bounds = array<i64: 2, 128>}]} {
    %c0 = arith.constant 0 : index
    %c0_0 = arith.constant 0 : index
    %0 = vector.load %arg1[%c0, %c0_0] : memref<2x32xf32, #tpu.memory_space<vmem>>, vector<2x32xf32>
    %c0_1 = arith.constant 0 : index
    %c0_2 = arith.constant 0 : index
    %1 = vector.load %arg3[%c0_1, %c0_2] : memref<128x32xf32, #tpu.memory_space<vmem>>, vector<128x32xf32>
    %cst = arith.constant dense<0.000000e+00> : vector<2x128xf32>
    %2 = tpu.matmul %0, %1, %cst {dimension_numbers = #tpu.dot_dimension_numbers<[1], [1], [0], [0], [0, 0, 1, 0], [], []>} : vector<2x32xf32>, vector<128x32xf32>, vector<2x128xf32> -> vector<2x128xf32>
    %c0_3 = arith.constant 0 : index
    %c0_4 = arith.constant 0 : index
    %3 = vector.load %arg2[%c0_3, %c0_4] : memref<2x1xi32, #tpu.memory_space<vmem>>, vector<2x1xi32>
    %4 = tpu.iota {dimensions = array<i32: 1>} : vector<2x5xi32>
    %5 = vector.broadcast %3 : vector<2x1xi32> to vector<2x5xi32>
    %6 = arith.cmpi eq, %4, %5 : vector<2x5xi32>
    %7 = arith.extui %6 : vector<2x5xi1> to vector<2x5xi32>
    %8 = arith.sitofp %7 : vector<2x5xi32> to vector<2x5xf32>
    %c0_5 = arith.constant 0 : index
    %c0_6 = arith.constant 0 : index
    %9 = vector.load %arg4[%c0_5, %c0_6] : memref<5x128xf32, #tpu.memory_space<vmem>>, vector<5x128xf32>
    %cst_7 = arith.constant dense<0.000000e+00> : vector<2x128xf32>
    %10 = tpu.matmul %8, %9, %cst_7 {dimension_numbers = #tpu.dot_dimension_numbers<[1], [0], [0], [1], [0, 0, 1, 1], [], []>} : vector<2x5xf32>, vector<5x128xf32>, vector<2x128xf32> -> vector<2x128xf32>
    %11 = arith.addf %2, %10 : vector<2x128xf32>
    %c0_8 = arith.constant 0 : index
    %c0_9 = arith.constant 0 : index
    %12 = vector.load %arg5[%c0_8, %c0_9] : memref<2x128xf32, #tpu.memory_space<vmem>>, vector<2x128xf32>
    tpu.vector_store %arg5[%c0_8, %c0_9], %11 {strides = array<i32>} : memref<2x128xf32, #tpu.memory_space<vmem>>, vector<2x128xf32>,
    return
  }
  func.func @transform_0(%arg0: i32) -> (i32, i32) {
    %c0_i32 = arith.constant 0 : i32
    %c0_i32_0 = arith.constant 0 : i32
    return %arg0, %c0_i32 : i32, i32
  }
  func.func @transform_1(%arg0: i32) -> (i32, i32) {
    %c0_i32 = arith.constant 0 : i32
    %c0_i32_0 = arith.constant 0 : i32
    return %arg0, %c0_i32 : i32, i32
  }
  func.func @transform_2(%arg0: i32) -> (i32, i32) {
    %c0_i32 = arith.constant 0 : i32
    %c0_i32_0 = arith.constant 0 : i32
    %c0_i32_1 = arith.constant 0 : i32
    return %c0_i32, %c0_i32_0 : i32, i32
  }
  func.func @transform_3(%arg0: i32) -> (i32, i32) {
    %c0_i32 = arith.constant 0 : i32
    %c0_i32_0 = arith.constant 0 : i32
    %c0_i32_1 = arith.constant 0 : i32
    return %c0_i32, %c0_i32_0 : i32, i32
  }
  func.func @transform_4(%arg0: i32) -> (i32, i32) {
    %c0_i32 = arith.constant 0 : i32
    %c0_i32_0 = arith.constant 0 : i32
    return %arg0, %c0_i32 : i32, i32
  }
}

</mosaic_0001>

<bundles_post_ra>
// kernel: tpu_custom_call.1
= control target key start
LH: loop header
LB: loop body
LE: loop exit
PB: predicated region body
PF: predicated region fallthrough
CT: control target
= control target key end

     0   :  { %v402_v3 = vmov 0   ;;  %v403_v4 = vmov 0.0|0.0   ;;  %vm123_vm0 = vcmask 261120   ;;  %v404_v7 = vmov 0.0   ;;  %s524_s0 = inlined_call_operand.vmem [shape: f32[2,32], index: 0, kind: input, shape index: {}]   ;;  %s525_s1 = inlined_call_operand.vmem [shape: s32[2,1], index: 1, kind: input, shape index: {}]   ;;  %s526_s2 = inlined_call_operand.vmem [shape: f32[128,32], index: 2, kind: input, shape index: {}]   ;;  %s527_s3 = inlined_call_operand.vmem [shape: f32[5,128], index: 3, kind: input, shape index: {}]   ;;  %s528_s4 = inlined_call_operand.hbm [shape: f32[2,128], index: 4, kind: output, shape index: {}]  }
   0x1   :  { %v35_v0 = vld [vmem:[%s525_s1] sm:$0x3]  ;;  %v20_v2 = vld [vmem:[%s526_s2 + $0x8] sm:$0xff]  ;;  %377 = vset.pattern.permute.xlu0 %v402_v3  ;;  %339 = vmatprep.subr.bf16.mxu0 %v403_v4  ;;  %vm443_vm1 = vmpackc.low %vm123_vm0, %vm123_vm0  ;;  %vm405_vm2 = vmmov 0   ;;  %vm49_vm3 = vcmask 1044480  }
   0x2   :  { %v19_v1 = vld [vmem:[%s526_s2] sm:$0xff]  ;;  %39 = vperm.xlu0 %377, %v35_v0   ;;  %299 = vmatprep.subr.mxu1 %v404_v7  ;;  %v21_v8 = vld [vmem:[%s526_s2 + $0x10] sm:$0xff]  ;;  %v22_v9 = vld [vmem:[%s526_s2 + $0x18] sm:$0xff] }
   0x3   :  { %v340_v5 = vpack.c.bf16 %v20_v2, %v19_v1  ;;  %336 = vmatprep.mubr.msk.f32.mxu0 %vm405_vm2, %v404_v7  ;;  %301 = vmatprep.mubr.msk.f32.mxu1 %vm405_vm2, %v404_v7  ;;  %v44_v10 = vld [vmem:[%s527_s3] sm:$0x1f] }
   0x5   :  { %342 = vmatpush3.bf16.xpose.msk.msra.mxu0 %vm443_vm1, %v340_v5 }
   0x6   :  { %343 = vmatprep.subr.bf16.mxu0 %v403_v4 }
   0x7   :  { %9 = vsyncpa [#allocation3], 0  ;;  %v344_v11 = vpack.c.bf16 %v22_v9, %v21_v8  ;;  %300 = vmatpush3.msk.msra.mxu1 %vm49_vm3, %v44_v10  ;;  %v23_v12 = vld [vmem:[%s526_s2 + $0x20] sm:$0xff]  ;;  %v24_v13 = vld [vmem:[%s526_s2 + $0x28] sm:$0xff]  ;;  %v36_v31 = vlaneseq  ;;  %vm45_vm4 = vcmask 39936  }
   0x8   :  { %v348_v14 = vpack.c.bf16 %v24_v13, %v23_v12  ;;  %v25_v15 = vld [vmem:[%s526_s2 + $0x30] sm:$0xff]  ;;  %v26_v16 = vld [vmem:[%s526_s2 + $0x38] sm:$0xff]  ;;  %v27_v18 = vld [vmem:[%s526_s2 + $0x40] sm:$0xff] }
   0x9   :  { %v352_v17 = vpack.c.bf16 %v26_v16, %v25_v15  ;;  %v28_v19 = vld [vmem:[%s526_s2 + $0x48] sm:$0xff]  ;;  %v29_v21 = vld [vmem:[%s526_s2 + $0x50] sm:$0xff]  ;;  %v30_v22 = vld [vmem:[%s526_s2 + $0x58] sm:$0xff]  ;;  %v37_v32 = vand.u32 127, %v36_v31 }
   0xa   :  { %v356_v20 = vpack.c.bf16 %v28_v19, %v27_v18  ;;  %v360_v23 = vpack.c.bf16 %v30_v22, %v29_v21  ;;  %v31_v24 = vld [vmem:[%s526_s2 + $0x60] sm:$0xff]  ;;  %v32_v25 = vld [vmem:[%s526_s2 + $0x68] sm:$0xff]  ;;  %v33_v27 = vld [vmem:[%s526_s2 + $0x70] sm:$0xff] }
   0xb   :  { %v364_v26 = vpack.c.bf16 %v32_v25, %v31_v24  ;;  %v34_v28 = vld [vmem:[%s526_s2 + $0x78] sm:$0xff]  ;;  %v18_v30 = vld [vmem:[%s524_s0] sm:$0x3]  ;;  %s406_s2 = smov [#allocation2]  }
   0xc   :  { %v368_v29 = vpack.c.bf16 %v34_v28, %v33_v27  ;;  %s252_s24 = sshll.u32 %s406_s2, 4  ;;  %s253_s24 = int_to_ptr.vmem [resolvable:$true] %s252_s24 }
   0xd   :  { %346 = vmatpush3.bf16.xpose.msk.msra.mxu0 %vm443_vm1, %v344_v11  ;;  %s378_s25 = scalar_lea.vmem %s253_s24, 32  ;;  %p383_p1 = scmp.lt.s32.totalorder %s253_s24, %s253_s24 }
   0xe   :  { %347 = vmatprep.subr.bf16.mxu0 %v403_v4  ;;  %p379_p0 = scmp.ne.s32.totalorder %s253_s24, %s378_s25  ;;  %p384_p2 = scmp.lt.s32.totalorder %s378_s25, %s378_s25 }
  0x10   :  { %p385_p3 = por %p384_p2, %p383_p1 }
  0x12   :  { %p386_p4 = pnand %p385_p3, %p379_p0 }
  0x15   :  { %350 = vmatpush3.bf16.xpose.msk.msra.mxu0 %vm443_vm1, %v348_v14 }
  0x16   :  { %351 = vmatprep.subr.bf16.mxu0 %v403_v4 }
  0x1d   :  { %354 = vmatpush3.bf16.xpose.msk.msra.mxu0 %vm443_vm1, %v352_v17 }
  0x1e   :  { %355 = vmatprep.subr.bf16.mxu0 %v403_v4 }
  0x25   :  { %358 = vmatpush3.bf16.xpose.msk.msra.mxu0 %vm443_vm1, %v356_v20 }
  0x26   :  { %359 = vmatprep.subr.bf16.mxu0 %v403_v4 }
  0x2d   :  { %362 = vmatpush3.bf16.xpose.msk.msra.mxu0 %vm443_vm1, %v360_v23 }
  0x2e   :  { %363 = vmatprep.subr.bf16.mxu0 %v403_v4 }
  0x35   :  { %366 = vmatpush3.bf16.xpose.msk.msra.mxu0 %vm443_vm1, %v364_v26 }
  0x36   :  { %367 = vmatprep.subr.bf16.mxu0 %v403_v4 }
  0x3d   :  { %370 = vmatpush3.bf16.xpose.msk.msra.mxu0 %vm443_vm1, %v368_v29 }
  0x44   :  { %337 = vmatmul.mubr.msk.f32.vlgmr.msra.gmra.mrb[0].mxu0 %vm123_vm0, %v18_v30 }
  0x81   :  { %v40_v33 = vpop.permute.xlu0 %39 }
  0x82   :  { %vm41_vm5 = vcmp.eq.s32.totalorder %v37_v32, %v40_v33 }
  0x83   :  { %v260_v34 = vsel %vm41_vm5, 1.0, %v404_v7 }
  0x84   :  { %302 = vmatmul.mubr.msk.f32.vlgmr.msra.gmra.mrb[0].mxu1 %vm45_vm4, %v260_v34 }
 0x117   :  { %v241_v35 = vpop.f32.mrb[0].mxu0 }
 0x118   :  { %v338_v36 = vpop.f32.mrb[1].mxu0 }
 0x157   :  { %v119_v37 = vpop.f32.mrb[0].mxu1 }
 0x158   :  { %v242_v38 = vadd.f32 %v241_v35, %v119_v37  ;;  %v303_v39 = vpop.f32.mrb[1].mxu1 }
 0x15a   :  { %245 = vst [vmem:[#allocation2] sm:$0x3] %v242_v38 }
 0x15b   :  { %389 = shalt.err (!%p386_p4)
}
 0x15c   :  { %s390_s27 = scalar_lea.hbm %s528_s4, 32 }
 0x15d   :  { %p391_p5 = scmp.ne.s32.totalorder %s528_s4, %s390_s27  ;;  %p394_p6 = scmp.lt.u32.totalorder %s390_s27, %s528_s4 }
 0x15f   :  { %p396_p7 = pnand %p394_p6, %p391_p5 }
 0x161   :  { %399 = shalt.err (!%p396_p7)
}
 0x162   :  { %255 = dma.vmem_to_hbm [thread:$0]  %s253_s24, 32, %s528_s4, [#allocation3]  }
 0x163   :  { %400 = dma.done.wait [#allocation3], 32  }
 0x164   :  { %401 = vsyncadd [#allocation3], 4294967264 }
 0x165   :  { %259 = vsyncpa [#allocation3], 1 }

// kernel: tpu_custom_call.1
= control target key start
LH: loop header
LB: loop body
LE: loop exit
PB: predicated region body
PF: predicated region fallthrough
CT: control target
= control target key end

     0   :  { %v402_v3 = vmov 0   ;;  %v403_v4 = vmov 0.0|0.0   ;;  %vm123_vm0 = vcmask 261120   ;;  %v404_v7 = vmov 0.0   ;;  %s524_s0 = inlined_call_operand.vmem [shape: f32[2,32], index: 0, kind: input, shape index: {}]   ;;  %s525_s1 = inlined_call_operand.vmem [shape: s32[2,1], index: 1, kind: input, shape index: {}]   ;;  %s526_s2 = inlined_call_operand.vmem [shape: f32[128,32], index: 2, kind: input, shape index: {}]   ;;  %s527_s3 = inlined_call_operand.vmem [shape: f32[5,128], index: 3, kind: input, shape index: {}]   ;;  %s528_s4 = inlined_call_operand.hbm [shape: f32[2,128], index: 4, kind: output, shape index: {}]  }
   0x1   :  { %v35_v0 = vld [vmem:[%s525_s1] sm:$0x3]  ;;  %v20_v2 = vld [vmem:[%s526_s2 + $0x8] sm:$0xff]  ;;  %377 = vset.pattern.permute.xlu0 %v402_v3  ;;  %339 = vmatprep.subr.bf16.mxu0 %v403_v4  ;;  %vm443_vm1 = vmpackc.low %vm123_vm0, %vm123_vm0  ;;  %vm405_vm2 = vmmov 0   ;;  %vm49_vm3 = vcmask 1044480  }
   0x2   :  { %v19_v1 = vld [vmem:[%s526_s2] sm:$0xff]  ;;  %39 = vperm.xlu0 %377, %v35_v0   ;;  %299 = vmatprep.subr.mxu1 %v404_v7  ;;  %v21_v8 = vld [vmem:[%s526_s2 + $0x10] sm:$0xff]  ;;  %v22_v9 = vld [vmem:[%s526_s2 + $0x18] sm:$0xff] }
   0x3   :  { %v340_v5 = vpack.c.bf16 %v20_v2, %v19_v1  ;;  %336 = vmatprep.mubr.msk.f32.mxu0 %vm405_vm2, %v404_v7  ;;  %301 = vmatprep.mubr.msk.f32.mxu1 %vm405_vm2, %v404_v7  ;;  %v44_v10 = vld [vmem:[%s527_s3] sm:$0x1f] }
   0x5   :  { %342 = vmatpush3.bf16.xpose.msk.msra.mxu0 %vm443_vm1, %v340_v5 }
   0x6   :  { %343 = vmatprep.subr.bf16.mxu0 %v403_v4 }
   0x7   :  { %9 = vsyncpa [#allocation3], 0  ;;  %v344_v11 = vpack.c.bf16 %v22_v9, %v21_v8  ;;  %300 = vmatpush3.msk.msra.mxu1 %vm49_vm3, %v44_v10  ;;  %v23_v12 = vld [vmem:[%s526_s2 + $0x20] sm:$0xff]  ;;  %v24_v13 = vld [vmem:[%s526_s2 + $0x28] sm:$0xff]  ;;  %v36_v31 = vlaneseq  ;;  %vm45_vm4 = vcmask 39936  }
   0x8   :  { %v348_v14 = vpack.c.bf16 %v24_v13, %v23_v12  ;;  %v25_v15 = vld [vmem:[%s526_s2 + $0x30] sm:$0xff]  ;;  %v26_v16 = vld [vmem:[%s526_s2 + $0x38] sm:$0xff]  ;;  %v27_v18 = vld [vmem:[%s526_s2 + $0x40] sm:$0xff] }
   0x9   :  { %v352_v17 = vpack.c.bf16 %v26_v16, %v25_v15  ;;  %v28_v19 = vld [vmem:[%s526_s2 + $0x48] sm:$0xff]  ;;  %v29_v21 = vld [vmem:[%s526_s2 + $0x50] sm:$0xff]  ;;  %v30_v22 = vld [vmem:[%s526_s2 + $0x58] sm:$0xff]  ;;  %v37_v32 = vand.u32 127, %v36_v31 }
   0xa   :  { %v356_v20 = vpack.c.bf16 %v28_v19, %v27_v18  ;;  %v360_v23 = vpack.c.bf16 %v30_v22, %v29_v21  ;;  %v31_v24 = vld [vmem:[%s526_s2 + $0x60] sm:$0xff]  ;;  %v32_v25 = vld [vmem:[%s526_s2 + $0x68] sm:$0xff]  ;;  %v33_v27 = vld [vmem:[%s526_s2 + $0x70] sm:$0xff] }
   0xb   :  { %v364_v26 = vpack.c.bf16 %v32_v25, %v31_v24  ;;  %v34_v28 = vld [vmem:[%s526_s2 + $0x78] sm:$0xff]  ;;  %v18_v30 = vld [vmem:[%s524_s0] sm:$0x3]  ;;  %s406_s2 = smov [#allocation2]  }
   0xc   :  { %v368_v29 = vpack.c.bf16 %v34_v28, %v33_v27  ;;  %s252_s24 = sshll.u32 %s406_s2, 4  ;;  %s253_s24 = int_to_ptr.vmem [resolvable:$true] %s252_s24 }
   0xd   :  { %346 = vmatpush3.bf16.xpose.msk.msra.mxu0 %vm443_vm1, %v344_v11  ;;  %s378_s25 = scalar_lea.vmem %s253_s24, 32  ;;  %p383_p1 = scmp.lt.s32.totalorder %s253_s24, %s253_s24 }
   0xe   :  { %347 = vmatprep.subr.bf16.mxu0 %v403_v4  ;;  %p379_p0 = scmp.ne.s32.totalorder %s253_s24, %s378_s25  ;;  %p384_p2 = scmp.lt.s32.totalorder %s378_s25, %s378_s25 }
  0x10   :  { %p385_p3 = por %p384_p2, %p383_p1 }
  0x12   :  { %p386_p4 = pnand %p385_p3, %p379_p0 }
  0x15   :  { %350 = vmatpush3.bf16.xpose.msk.msra.mxu0 %vm443_vm1, %v348_v14 }
  0x16   :  { %351 = vmatprep.subr.bf16.mxu0 %v403_v4 }
  0x1d   :  { %354 = vmatpush3.bf16.xpose.msk.msra.mxu0 %vm443_vm1, %v352_v17 }
  0x1e   :  { %355 = vmatprep.subr.bf16.mxu0 %v403_v4 }
  0x25   :  { %358 = vmatpush3.bf16.xpose.msk.msra.mxu0 %vm443_vm1, %v356_v20 }
  0x26   :  { %359 = vmatprep.subr.bf16.mxu0 %v403_v4 }
  0x2d   :  { %362 = vmatpush3.bf16.xpose.msk.msra.mxu0 %vm443_vm1, %v360_v23 }
  0x2e   :  { %363 = vmatprep.subr.bf16.mxu0 %v403_v4 }
  0x35   :  { %366 = vmatpush3.bf16.xpose.msk.msra.mxu0 %vm443_vm1, %v364_v26 }
  0x36   :  { %367 = vmatprep.subr.bf16.mxu0 %v403_v4 }
  0x3d   :  { %370 = vmatpush3.bf16.xpose.msk.msra.mxu0 %vm443_vm1, %v368_v29 }
  0x44   :  { %337 = vmatmul.mubr.msk.f32.vlgmr.msra.gmra.mrb[0].mxu0 %vm123_vm0, %v18_v30 }
  0x81   :  { %v40_v33 = vpop.permute.xlu0 %39 }
  0x82   :  { %vm41_vm5 = vcmp.eq.s32.totalorder %v37_v32, %v40_v33 }
  0x83   :  { %v260_v34 = vsel %vm41_vm5, 1.0, %v404_v7 }
  0x84   :  { %302 = vmatmul.mubr.msk.f32.vlgmr.msra.gmra.mrb[0].mxu1 %vm45_vm4, %v260_v34 }
 0x117   :  { %v241_v35 = vpop.f32.mrb[0].mxu0 }
 0x118   :  { %v338_v36 = vpop.f32.mrb[1].mxu0 }
 0x157   :  { %v119_v37 = vpop.f32.mrb[0].mxu1 }
 0x158   :  { %v242_v38 = vadd.f32 %v241_v35, %v119_v37  ;;  %v303_v39 = vpop.f32.mrb[1].mxu1 }
 0x15a   :  { %245 = vst [vmem:[#allocation2] sm:$0x3] %v242_v38 }
 0x15b   :  { %389 = shalt.err (!%p386_p4)
}
 0x15c   :  { %s390_s27 = scalar_lea.hbm %s528_s4, 32 }
 0x15d   :  { %p391_p5 = scmp.ne.s32.totalorder %s528_s4, %s390_s27  ;;  %p394_p6 = scmp.lt.u32.totalorder %s390_s27, %s528_s4 }
 0x15f   :  { %p396_p7 = pnand %p394_p6, %p391_p5 }
 0x161   :  { %399 = shalt.err (!%p396_p7)
}
 0x162   :  { %255 = dma.vmem_to_hbm [thread:$0]  %s253_s24, 32, %s528_s4, [#allocation3]  }
 0x163   :  { %400 = dma.done.wait [#allocation3], 32  }
 0x164   :  { %401 = vsyncadd [#allocation3], 4294967264 }
 0x165   :  { %259 = vsyncpa [#allocation3], 1 }

</bundles_post_ra>
